<compile_context>
chip_gen: v6e
topology: v6e:2x2x1
jax: 0.10.0
libtpu: 0.0.40
codegen_flags: <defaults>
</compile_context>

<pallas_src>
import functools
import math

import jax
import jax.numpy as jnp
from jax.experimental import pallas as pl
from jax.experimental.pallas import tpu as pltpu

_MIB = 1024 * 1024


def _fused_bias_leaky_relu_kernel(b_ref, x_ref, o_ref, *, negative_slope, scale):
    # b_ref: fp32 bias tile, either a (TM, 1) column or a (1, TK) row; broadcasts.
    v = x_ref[...].astype(jnp.float32) + b_ref[...]
    o_ref[...] = (jnp.where(v >= 0.0, v, v * negative_slope) * scale).astype(o_ref.dtype)


def _leaky_relu_kernel(x_ref, o_ref, *, negative_slope, scale):
    v = x_ref[...].astype(jnp.float32)
    o_ref[...] = (jnp.where(v >= 0.0, v, v * negative_slope) * scale).astype(o_ref.dtype)


def _round_up(x, m):
    return ((x + m - 1) // m) * m


@functools.lru_cache(maxsize=None)
def _per_buffer_budget_bytes():
    """Per-pipeline-buffer tile budget. ~4 MiB everywhere; ~6 MiB on v7x."""
    budget = 4 * _MIB
    try:
        info = pltpu.get_tpu_info()
        vmem = getattr(info, "vmem_capacity_bytes", None)
        # v7x is the only generation with 64 MiB per-core VMEM; its 3.2 TB/s HBM
        # makes bigger tiles worthwhile to amortize the ~0.35 us/grid-step overhead.
        if vmem is not None and vmem <= 80 * _MIB:
            budget = 6 * _MIB
    except Exception:
        pass
    return budget


def _pick_blocks(rows, cols, itemsize, target_bytes):
    """Pick (TM, TK, packing) ~ target_bytes/buffer, honoring TPU tiling rules."""
    packing = max(8, 32 // max(1, itemsize))          # 8 f32, 16 bf16, 32 int8/fp8
    target_elems = max(1, target_bytes // max(1, itemsize))

    # Lane (last) dim: multiple of 128, or full extent when the array is narrower.
    if cols < 128:
        tk = cols
    else:
        lane_cap = max(128, (target_elems // packing) // 128 * 128)
        tk = min(lane_cap, (cols // 128) * 128)

    # Sublane (second-last) dim: multiple of the packing factor, or full extent.
    row_budget = max(1, target_elems // max(1, tk))
    if rows <= packing:
        tm = rows
    else:
        tm = min(max(packing, (row_budget // packing) * packing),
                 (rows // packing) * packing)
    return tm, tk, packing


def _ensure_two_steps(rows, cols, tm, tk, packing, itemsize):
    """v7x has 2 TensorCores: give the 'parallel' grid >= 2 steps on big arrays."""
    if rows * cols * itemsize <= _MIB:
        return tm, tk
    if pl.cdiv(rows, tm) * pl.cdiv(cols, tk) > 1:
        return tm, tk
    if rows > packing:
        tm = _round_up(pl.cdiv(rows, 2), packing)
    elif cols > 128:
        tk = _round_up(pl.cdiv(cols, 2), 128)
    return tm, tk


def fused_leaky_relu(x, bias=None, negative_slope=0.2, scale=2.0 ** 0.5):
    """out = leaky_relu(x + bias.view(1, C, 1, ..., 1), negative_slope) * scale"""
    if x.ndim < 2:
        raise ValueError("fused_leaky_relu expects input with ndim >= 2")

    orig_shape = x.shape
    N, C = orig_shape[0], orig_shape[1]
    spatial = int(math.prod(orig_shape[2:])) if x.ndim > 2 else 1
    itemsize = jnp.dtype(x.dtype).itemsize

    bias_f32 = None if bias is None else bias.astype(jnp.float32)

    # ---- layout selection (lane-dense output is the priority) ----
    if x.ndim == 2:
        rows, cols = N, C
        x2d = x
        bias_is_col = False
    elif spatial < 128:
        # Small-spatial layers: flatten channels into the lane dim.
        rows, cols = N, C * spatial
        x2d = x.reshape(rows, cols)
        bias_is_col = False
        if bias_f32 is not None:
            bias_f32 = jnp.repeat(bias_f32, spatial)        # (C*spatial,) fp32, tiny
    else:
        rows, cols = N * C, spatial
        x2d = x.reshape(rows, cols)
        bias_is_col = True

    # ---- tile sizing ----
    target_bytes = _per_buffer_budget_bytes()
    tm, tk, packing = _pick_blocks(rows, cols, itemsize, target_bytes)

    if bias_is_col and bias_f32 is not None and rows > packing:
        # Cap TM: a (TM, 1) fp32 VMEM block lane-pads to TM*128*4 bytes.
        tm = min(tm, 512)

    tm, tk = _ensure_two_steps(rows, cols, tm, tk, packing, itemsize)
    grid = (pl.cdiv(rows, tm), pl.cdiv(cols, tk))

    data_spec = pl.BlockSpec((tm, tk), lambda i, j: (i, j))
    x_tile_bytes = _round_up(tm, packing) * _round_up(tk, 128) * itemsize

    # ---- bias operand / spec ----
    if bias_f32 is None:
        kernel = functools.partial(_leaky_relu_kernel,
                                   negative_slope=float(negative_slope),
                                   scale=float(scale))
        in_specs = [data_spec]
        operands = (x2d,)
        bias_tile_bytes = 0
    else:
        if bias_is_col:
            if C % tm == 0:
                # Index the raw (C, 1) bias with a wrapping block index: no
                # (N*C, 1) tiled copy materialized in HBM.
                nb = C // tm
                bias2d = bias_f32[:, None]
                bias_spec = pl.BlockSpec((tm, 1), lambda i, j, nb=nb: (i % nb, 0))
            else:
                bias2d = jnp.tile(bias_f32, N)[:, None]     # (N*C, 1) fp32
                bias_spec = pl.BlockSpec((tm, 1), lambda i, j: (i, 0))
            bias_tile_bytes = _round_up(tm, 8) * 128 * 4
        else:
            bias2d = bias_f32[None, :]                      # (1, cols) fp32
            bias_spec = pl.BlockSpec((1, tk), lambda i, j: (0, j))
            bias_tile_bytes = 8 * _round_up(tk, 128) * 4
        kernel = functools.partial(_fused_bias_leaky_relu_kernel,
                                   negative_slope=float(negative_slope),
                                   scale=float(scale))
        in_specs = [bias_spec, data_spec]
        operands = (bias2d, x2d)

    # Explicit scoped-VMEM limit: x + out double-buffered, bias double-buffered,
    # plus headroom.  Keeps v5e (16 MiB default) from rejecting 4-6 MiB tiles.
    vmem_limit = 2 * 2 * x_tile_bytes + 2 * bias_tile_bytes + 4 * _MIB
    vmem_limit = int(max(vmem_limit, 16 * _MIB))

    out2d = pl.pallas_call(
        kernel,
        out_shape=jax.ShapeDtypeStruct((rows, cols), x.dtype),
        grid_spec=pltpu.PrefetchScalarGridSpec(
            num_scalar_prefetch=0,
            grid=grid,
            in_specs=in_specs,
            out_specs=data_spec,
        ),
        compiler_params=pltpu.CompilerParams(
            dimension_semantics=("parallel", "parallel"),
            vmem_limit_bytes=vmem_limit,
        ),
    )(*operands)

    return out2d.reshape(orig_shape)


class FusedLeakyReLU:
    """Mirror of the PyTorch module; bias is a learnable parameter init'd to zeros."""

    def __init__(self, channel, bias=True, negative_slope=0.2, scale=2.0 ** 0.5):
        self.bias = jnp.zeros((channel,), dtype=jnp.float32) if bias else None
        self.negative_slope = negative_slope
        self.scale = scale

    def __call__(self, x):
        return fused_leaky_relu(x, self.bias, self.negative_slope, self.scale)


def _reference(x, bias, negative_slope, scale):
    if bias is not None:
        rest = (1,) * (x.ndim - 2)
        v = x.astype(jnp.float32) + bias.reshape((1, bias.shape[0]) + rest).astype(jnp.float32)
    else:
        v = x.astype(jnp.float32)
    return (jnp.where(v >= 0, v, v * negative_slope) * scale).astype(x.dtype)


if __name__ == "__main__":
    key = jax.random.PRNGKey(0)

    # 4D path with spatial >= 128 (column-bias layout).
    N, C, H, W = 2, 4, 16, 16
    x = jax.random.normal(key, (N, C, H, W), dtype=jnp.float32)
    mod = FusedLeakyReLU(C, bias=True)
    mod.bias = jnp.linspace(-0.5, 0.5, C, dtype=jnp.float32)
    out = jax.block_until_ready(mod(x))
    ref = _reference(x, mod.bias, mod.negative_slope, mod.scale)
    assert out.shape == (N, C, H, W)
    assert jnp.allclose(out, ref, atol=1e-5, rtol=1e-5)

    # Small-spatial path (spatial < 128 -> lane-dense (N, C*spatial) layout).
    Ns, Cs = 2, 8
    xs = jax.random.normal(jax.random.PRNGKey(2), (Ns, Cs, 4, 4), dtype=jnp.float32)
    mods = FusedLeakyReLU(Cs, bias=True)
    mods.bias = jnp.linspace(-1.0, 1.0, Cs, dtype=jnp.float32)
    outs = jax.block_until_ready(mods(xs))
    refs = _reference(xs, mods.bias, mods.negative_slope, mods.scale)
    assert jnp.allclose(outs, refs, atol=1e-5, rtol=1e-5)

    # 2D (post-linear, EqualLinear) path.
    x2 = jax.random.normal(jax.random.PRNGKey(1), (N, C), dtype=jnp.float32)
    out2 = jax.block_until_ready(mod(x2))
    ref2 = _reference(x2, mod.bias, mod.negative_slope, mod.scale)
    assert jnp.allclose(out2, ref2, atol=1e-5, rtol=1e-5)

    # bias=None specialized kernel.
    modnb = FusedLeakyReLU(C, bias=False)
    out3 = jax.block_until_ready(modnb(x))
    ref3 = _reference(x, None, modnb.negative_slope, modnb.scale)
    assert jnp.allclose(out3, ref3, atol=1e-5, rtol=1e-5)

    print("KERNEL_OK")
</pallas_src>

<mosaic_0001>
module attributes {stable_mosaic.version = 11 : i64} {
  func.func @_fused_bias_leaky_relu_kernel(%arg0: i32, %arg1: i32, %arg2: memref<8x1xf32, #tpu.memory_space<vmem>>, %arg3: memref<8x256xf32, #tpu.memory_space<vmem>>, %arg4: memref<8x256xf32, #tpu.memory_space<vmem>>) attributes {dimension_semantics = [#tpu.dimension_semantics<parallel>, #tpu.dimension_semantics<parallel>], iteration_bounds = array<i64: 1, 1>, scalar_prefetch = 0 : i64, scratch_operands = 0 : i64, tpu.core_type = #tpu.core_type<tc>, window_params = [{transform_indices = @transform_0, window_bounds = array<i64: 8, 1>}, {transform_indices = @transform_1, window_bounds = array<i64: 8, 256>}, {transform_indices = @transform_2, window_bounds = array<i64: 8, 256>}]} {
    %c0 = arith.constant 0 : index
    %c0_0 = arith.constant 0 : index
    %0 = vector.load %arg3[%c0, %c0_0] : memref<8x256xf32, #tpu.memory_space<vmem>>, vector<8x256xf32>
    %c0_1 = arith.constant 0 : index
    %c0_2 = arith.constant 0 : index
    %1 = vector.load %arg2[%c0_1, %c0_2] : memref<8x1xf32, #tpu.memory_space<vmem>>, vector<8x1xf32>
    %2 = vector.broadcast %1 : vector<8x1xf32> to vector<8x256xf32>
    %3 = arith.addf %0, %2 : vector<8x256xf32>
    %cst = arith.constant 0.000000e+00 : f32
    %4 = vector.broadcast %cst : f32 to vector<8x256xf32>
    %5 = arith.cmpf oge, %3, %4 : vector<8x256xf32>
    %cst_3 = arith.constant 2.000000e-01 : f32
    %6 = vector.broadcast %cst_3 : f32 to vector<8x256xf32>
    %7 = arith.mulf %3, %6 : vector<8x256xf32>
    %8 = arith.select %5, %3, %7 : vector<8x256xi1>, vector<8x256xf32>
    %cst_4 = arith.constant 1.41421354 : f32
    %9 = vector.broadcast %cst_4 : f32 to vector<8x256xf32>
    %10 = arith.mulf %8, %9 : vector<8x256xf32>
    %c0_5 = arith.constant 0 : index
    %c0_6 = arith.constant 0 : index
    %11 = vector.load %arg4[%c0_5, %c0_6] : memref<8x256xf32, #tpu.memory_space<vmem>>, vector<8x256xf32>
    tpu.vector_store %arg4[%c0_5, %c0_6], %10 {strides = array<i32>} : memref<8x256xf32, #tpu.memory_space<vmem>>, vector<8x256xf32>,
    return
  }
  func.func @transform_0(%arg0: i32, %arg1: i32) -> (i32, i32) {
    %c0_i32 = arith.constant 0 : i32
    %c0_i32_0 = arith.constant 0 : i32
    return %arg0, %c0_i32 : i32, i32
  }
  func.func @transform_1(%arg0: i32, %arg1: i32) -> (i32, i32) {
    %c0_i32 = arith.constant 0 : i32
    return %arg0, %arg1 : i32, i32
  }
  func.func @transform_2(%arg0: i32, %arg1: i32) -> (i32, i32) {
    %c0_i32 = arith.constant 0 : i32
    return %arg0, %arg1 : i32, i32
  }
}

</mosaic_0001>

<bundles_post_ra>
// kernel: tpu_custom_call.1
= control target key start
LH: loop header
LB: loop body
LE: loop exit
PB: predicated region body
PF: predicated region fallthrough
CT: control target
= control target key end

     0   :  { %7 = vsyncpa [#allocation3], 0  ;;  %s134_s0 = inlined_call_operand.vmem [shape: f32[8,1], index: 0, kind: input, shape index: {}]   ;;  %s135_s1 = inlined_call_operand.hbm [shape: f32[8,256], index: 1, kind: input, shape index: {}]   ;;  %s136_s2 = inlined_call_operand.hbm [shape: f32[8,256], index: 2, kind: output, shape index: {}]  }
   0x1   :  { %8 = vsyncpa [#allocation4], 0  ;;  %s107_s9 = smov [#allocation2]  }
   0x2   :  { %s17_s10 = sshll.u32 %s107_s9, 4  ;;  %s18_s10 = int_to_ptr.vmem [resolvable:$true] %s17_s10 }
   0x3   :  { %s71_s11 = scalar_lea.vmem %s18_s10, 256  ;;  %p76_p1 = scmp.lt.s32.totalorder %s18_s10, %s18_s10 }
   0x4   :  { %p72_p0 = scmp.ne.s32.totalorder %s18_s10, %s71_s11  ;;  %p77_p2 = scmp.lt.s32.totalorder %s71_s11, %s71_s11 }
   0x6   :  { %p78_p3 = por %p77_p2, %p76_p1 }
   0x8   :  { %p79_p4 = pnand %p78_p3, %p72_p0 }
   0xa   :  { %82 = shalt.err (!%p79_p4)
}
   0xb   :  { %20 = dma.hbm_to_vmem [thread:$0]  %s135_s1, 256, %s18_s10, [#allocation3]  }
   0xc   :  { %103 = dma.done.wait [#allocation3], 256  }
   0xd   :  { %104 = vsyncadd [#allocation3], 4294967040  ;;  %v108_v0 = vmov 0   ;;  %v26_v1 = vld [vmem:[%s134_s0] sm:$0xff]  ;;  %v25_v3 = vld [vmem:[#allocation2 + $0x8] sm:$0xff]  ;;  %s109_s16 = smov [#allocation5]  }
   0xe   :  { %62 = vset.pattern.permute.xlu0 %v108_v0  ;;  %v24_v2 = vld [vmem:[#allocation2] sm:$0xff]  ;;  %s50_s17 = sshll.u32 %s109_s16, 4  ;;  %s51_s17 = int_to_ptr.vmem [resolvable:$true] %s50_s17 }
   0xf   :  { %29 = vperm.xlu0 %62, %v26_v1   ;;  %s83_s0 = scalar_lea.vmem %s51_s17, 256  ;;  %p88_p6 = scmp.lt.s32.totalorder %s51_s17, %s51_s17 }
  0x10   :  { %p84_p5 = scmp.ne.s32.totalorder %s51_s17, %s83_s0  ;;  %p89_p7 = scmp.lt.s32.totalorder %s83_s0, %s83_s0 }
  0x12   :  { %p90_p8 = por %p89_p7, %p88_p6 }
  0x14   :  { %p91_p9 = pnand %p90_p8, %p84_p5 }
  0x8a   :  { %v30_v4 = vpop.permute.xlu0 %29 }
  0x8b   :  { %v32_v5 = vadd.f32 %v30_v4, %v24_v2  ;;  %v33_v6 = vadd.f32 %v30_v4, %v25_v3 }
  0x8d   :  { %vm34_vm0 = vcmp.ge.f32.partialorder %v32_v5, 0.0  ;;  %vm35_vm1 = vcmp.ge.f32.partialorder %v33_v6, 0.0  ;;  %v36_v7 = vmul.f32 0.2, %v32_v5  ;;  %v37_v8 = vmul.f32 0.2, %v33_v6 }
  0x8f   :  { %v38_v9 = vsel %vm34_vm0, %v32_v5, %v36_v7  ;;  %v39_v10 = vsel %vm35_vm1, %v33_v6, %v37_v8 }
  0x90   :  { %v40_v11 = vmul.f32 1.4142135, %v38_v9  ;;  %v41_v12 = vmul.f32 1.4142135, %v39_v10 }
  0x92   :  { %42 = vst [vmem:[#allocation5] sm:$0xff] %v40_v11  ;;  %43 = vst [vmem:[#allocation5 + $0x8] sm:$0xff] %v41_v12 }
  0x93   :  { %94 = shalt.err (!%p91_p9)
}
  0x94   :  { %53 = dma.vmem_to_hbm [thread:$0]  %s51_s17, 256, %s136_s2, [#allocation4]  }
  0x95   :  { %105 = dma.done.wait [#allocation4], 256  }
  0x96   :  { %106 = vsyncadd [#allocation4], 4294967040 }
  0x97   :  { %57 = vsyncpa [#allocation3], 1 }
  0x98   :  { %58 = vsyncpa [#allocation4], 1 }

</bundles_post_ra>
